<compile_context>
chip_gen: v5e
topology: v5e:2x2
jax: 0.10.0
libtpu: 0.0.40
codegen_flags: <defaults>
</compile_context>

<pallas_src>
import functools

import jax
import jax.numpy as jnp
from jax.experimental import pallas as pl
from jax.experimental.pallas import tpu as pltpu


def _round_up(n, m):
    return ((n + m - 1) // m) * m


def actor_mlp_kernel(x_ref, w1_ref, b1_ref, w2_ref, b2_ref, w3_ref, b3_ref,
                     out_ref, *, use_relu):
    """Fused 3-layer MLP + softmax, batch-on-lanes: x (d_in, tile) -> prob (A, tile)."""
    act = (lambda v: jnp.maximum(v, 0.0)) if use_relu else jnp.tanh
    mxu_dtype = w1_ref.dtype  # matmul operand dtype (f32 for tiny dims, else bf16)

    x = x_ref[...]                                        # (d_in, tile), already mxu_dtype
    h1 = jnp.dot(w1_ref[...], x,
                 preferred_element_type=jnp.float32) + b1_ref[...]   # (hidden, tile) f32
    h1 = act(h1)

    h2 = jnp.dot(w2_ref[...], h1.astype(mxu_dtype),
                 preferred_element_type=jnp.float32) + b2_ref[...]   # (hidden, tile) f32
    h2 = act(h2)

    logits = jnp.dot(w3_ref[...], h2.astype(mxu_dtype),
                     preferred_element_type=jnp.float32) + b3_ref[...]  # (A, tile) f32

    # Numerically stable softmax over the action (sublane) axis.
    m = jnp.max(logits, axis=0, keepdims=True)            # (1, tile) -- XLU sublane reduce
    e = jnp.exp(logits - m)                               # lane-dense EUP
    s = jnp.sum(e, axis=0, keepdims=True)
    # EUP approximate reciprocal + two Newton refinements -> ~f32-exact 1/s.
    r = pl.reciprocal(s, approx=True)
    r = r * (2.0 - s * r)
    r = r * (2.0 - s * r)

    out_ref[...] = (e * r).astype(out_ref.dtype)


def _choose_batch_tile(B, batch_tile):
    """Lane-dense batch tile (multiple of 128); single grid step whenever B fits."""
    tile = min(batch_tile, _round_up(B, 128))
    return max(128, (tile // 128) * 128)


def actor_mlp_forward(x, params, *, use_relu=False, batch_tile=1024,
                      matmul_dtype=None):
    """x: (B, actor_input_dim) -> prob: (B, action_dim) in f32."""
    w1, b1, w2, b2, w3, b3 = params          # w: (out, in), b: (out, 1)
    B, d_in = x.shape
    hidden = w1.shape[0]
    action_dim = w3.shape[0]

    if matmul_dtype is None:
        # Tiny contraction/output dims -> MXU is latency-bound either way; keep f32.
        matmul_dtype = (jnp.float32 if max(d_in, hidden, action_dim) < 128
                        else jnp.bfloat16)
    matmul_dtype = jnp.dtype(matmul_dtype)
    itemsize = matmul_dtype.itemsize

    tile = _choose_batch_tile(B, batch_tile)
    grid_b = pl.cdiv(B, tile)
    b_pad = grid_b * tile

    # Batch-on-lanes: present x^T (d_in, B_pad); the pad fuses with the transpose.
    xt = x.T
    if b_pad != B:
        xt = jnp.pad(xt, ((0, 0), (0, b_pad - B)))

    # Pre-cast matmul operands once in the wrapper (halves the weight/x DMA bytes
    # when bf16 is used; never re-casts grid-invariant weights inside the kernel).
    xt = xt.astype(matmul_dtype)
    w1c = w1.astype(matmul_dtype)
    w2c = w2.astype(matmul_dtype)
    w3c = w3.astype(matmul_dtype)

    kernel = functools.partial(actor_mlp_kernel, use_relu=use_relu)

    # Weights / biases never change across the grid -> single-buffer them so only
    # the x and prob tiles need pipelining (default double-buffering is plenty at
    # grid_b <= a few steps).
    def const_spec(shape):
        return pl.BlockSpec(shape, lambda i: (0, 0), pipeline_mode=pl.Buffered(1))

    # Advisory cost estimate so XLA can overlap this call with surrounding ops.
    flops = 2 * b_pad * (d_in * hidden + hidden * hidden + hidden * action_dim)
    transcendentals = b_pad * ((0 if use_relu else 2 * hidden) + action_dim + 1)
    bytes_accessed = (b_pad * d_in * itemsize + b_pad * action_dim * 4
                      + (d_in * hidden + hidden * hidden + hidden * action_dim) * itemsize
                      + (2 * hidden + action_dim) * 4)
    cost = pl.CostEstimate(flops=flops, transcendentals=transcendentals,
                           bytes_accessed=bytes_accessed)

    # Rough VMEM footprint: double-buffered x/out tiles + single-buffered weights
    # + activation headroom.  Raise the scoped limit from ~12 MiB (v5e default is
    # 16 MiB) and cap at 48 MiB (v7x has only 64 MiB physical VMEM per core).
    vmem_est = (2 * tile * d_in * itemsize
                + 2 * tile * action_dim * 4
                + (d_in * hidden + hidden * hidden + hidden * action_dim) * itemsize
                + (2 * hidden + action_dim) * 4
                + 4 * tile * hidden * 4)
    cp_kwargs = dict(dimension_semantics=("parallel",))
    if vmem_est > 12 * 1024 * 1024:
        cp_kwargs["vmem_limit_bytes"] = min(2 * vmem_est, 48 * 1024 * 1024)

    out_t = pl.pallas_call(
        kernel,
        out_shape=jax.ShapeDtypeStruct((action_dim, b_pad), jnp.float32),
        grid_spec=pltpu.PrefetchScalarGridSpec(
            num_scalar_prefetch=0,
            grid=(grid_b,),
            in_specs=[
                pl.BlockSpec((d_in, tile), lambda i: (0, i)),
                const_spec((hidden, d_in)),
                const_spec((hidden, 1)),
                const_spec((hidden, hidden)),
                const_spec((hidden, 1)),
                const_spec((action_dim, hidden)),
                const_spec((action_dim, 1)),
            ],
            out_specs=pl.BlockSpec((action_dim, tile), lambda i: (0, i)),
        ),
        compiler_params=pltpu.CompilerParams(**cp_kwargs),
        cost_estimate=cost,
    )(xt, w1c, b1, w2c, b2, w3c, b3)

    # Layout plumbing back to the PyTorch-facing (B, action_dim) shape.
    out = out_t[:, :B].T if b_pad != B else out_t.T
    return out


def init_params(key, actor_input_dim, hidden_dim, action_dim):
    """Deterministic orthogonal init (gain 1.0, 1.0, 0.01); zero biases.

    Weights are stored in PyTorch nn.Linear layout: (out_features, in_features).
    Biases are stored as (out_features, 1) columns for the batch-on-lanes kernel.
    """
    k1, k2, k3 = jax.random.split(key, 3)
    ortho = jax.nn.initializers.orthogonal
    w1 = ortho(scale=1.0)(k1, (hidden_dim, actor_input_dim), jnp.float32)
    w2 = ortho(scale=1.0)(k2, (hidden_dim, hidden_dim), jnp.float32)
    w3 = ortho(scale=0.01)(k3, (action_dim, hidden_dim), jnp.float32)
    b1 = jnp.zeros((hidden_dim, 1), jnp.float32)
    b2 = jnp.zeros((hidden_dim, 1), jnp.float32)
    b3 = jnp.zeros((action_dim, 1), jnp.float32)
    return (w1, b1, w2, b2, w3, b3)


def reference_forward(x, params, *, use_relu=False):
    """Plain-JAX reference matching the PyTorch forward (x @ W.T + b)."""
    w1, b1, w2, b2, w3, b3 = params
    act = (lambda v: jnp.maximum(v, 0.0)) if use_relu else jnp.tanh
    h = act(x @ w1.T + b1.T)
    h = act(h @ w2.T + b2.T)
    return jax.nn.softmax(h @ w3.T + b3.T, axis=-1)


if __name__ == "__main__":
    # args: actor_input_dim=16, mlp_hidden_dim=32, action_dim=8,
    #       use_relu=0 (Tanh), use_orthogonal_init=True
    actor_input_dim, hidden_dim, action_dim = 16, 32, 8
    use_relu = False

    key = jax.random.PRNGKey(0)
    k_x, k_p = jax.random.split(key)
    params = init_params(k_p, actor_input_dim, hidden_dim, action_dim)

    fwd = jax.jit(functools.partial(actor_mlp_forward, use_relu=use_relu))

    # Main run: B=256 -> one lane-dense 256-wide grid step, f32 matmuls (auto).
    B = 256
    x = jax.random.normal(k_x, (B, actor_input_dim), jnp.float32)
    ref = reference_forward(x, params, use_relu=use_relu)

    prob = jax.block_until_ready(fwd(x, params))
    assert prob.shape == (B, action_dim)
    assert jnp.allclose(jnp.sum(prob, axis=-1), 1.0, atol=1e-5)
    assert jnp.allclose(prob, ref, atol=1e-5, rtol=1e-5)

    # Multi-step grid path: batch_tile=128 -> 2 grid steps, exercises index_maps
    # and the "parallel" batch axis.
    prob_2step = jax.block_until_ready(
        actor_mlp_forward(x, params, use_relu=use_relu, batch_tile=128))
    assert jnp.allclose(prob_2step, ref, atol=1e-5, rtol=1e-5)

    # bf16 MXU-operand path (pre-cast in wrapper), f32 accumulation / softmax.
    prob_bf16 = jax.block_until_ready(
        actor_mlp_forward(x, params, use_relu=use_relu,
                          matmul_dtype=jnp.bfloat16))
    assert jnp.allclose(jnp.sum(prob_bf16, axis=-1), 1.0, atol=1e-5)
    assert jnp.allclose(prob_bf16, ref, atol=5e-3, rtol=5e-2)

    # Ragged batch: exercises the pad-to-128-lanes + output-slice path.
    B2 = 200
    x2 = jax.random.normal(k_x, (B2, actor_input_dim), jnp.float32)
    prob2 = jax.block_until_ready(fwd(x2, params))
    ref2 = reference_forward(x2, params, use_relu=use_relu)
    assert prob2.shape == (B2, action_dim)
    assert jnp.allclose(prob2, ref2, atol=1e-5, rtol=1e-5)

    print("KERNEL_OK")
</pallas_src>

<mosaic_0001>
module attributes {stable_mosaic.version = 11 : i64} {
  func.func @actor_mlp_kernel(%arg0: i32, %arg1: memref<16x256xf32, #tpu.memory_space<vmem>>, %arg2: memref<32x16xf32, #tpu.memory_space<vmem>>, %arg3: memref<32x1xf32, #tpu.memory_space<vmem>>, %arg4: memref<32x32xf32, #tpu.memory_space<vmem>>, %arg5: memref<32x1xf32, #tpu.memory_space<vmem>>, %arg6: memref<8x32xf32, #tpu.memory_space<vmem>>, %arg7: memref<8x1xf32, #tpu.memory_space<vmem>>, %arg8: memref<8x256xf32, #tpu.memory_space<vmem>>) attributes {dimension_semantics = [#tpu.dimension_semantics<parallel>], iteration_bounds = array<i64: 1>, scalar_prefetch = 0 : i64, scratch_operands = 0 : i64, tpu.core_type = #tpu.core_type<tc>, window_params = [{transform_indices = @transform_0, window_bounds = array<i64: 16, 256>}, {pipeline_mode = #tpu.pipeline_mode<synchronous>, transform_indices = @transform_1, window_bounds = array<i64: 32, 16>}, {pipeline_mode = #tpu.pipeline_mode<synchronous>, transform_indices = @transform_2, window_bounds = array<i64: 32, 1>}, {pipeline_mode = #tpu.pipeline_mode<synchronous>, transform_indices = @transform_3, window_bounds = array<i64: 32, 32>}, {pipeline_mode = #tpu.pipeline_mode<synchronous>, transform_indices = @transform_4, window_bounds = array<i64: 32, 1>}, {pipeline_mode = #tpu.pipeline_mode<synchronous>, transform_indices = @transform_5, window_bounds = array<i64: 8, 32>}, {pipeline_mode = #tpu.pipeline_mode<synchronous>, transform_indices = @transform_6, window_bounds = array<i64: 8, 1>}, {transform_indices = @transform_7, window_bounds = array<i64: 8, 256>}]} {
    %c0 = arith.constant 0 : index
    %c0_0 = arith.constant 0 : index
    %0 = vector.load %arg1[%c0, %c0_0] : memref<16x256xf32, #tpu.memory_space<vmem>>, vector<16x256xf32>
    %c0_1 = arith.constant 0 : index
    %c0_2 = arith.constant 0 : index
    %1 = vector.load %arg2[%c0_1, %c0_2] : memref<32x16xf32, #tpu.memory_space<vmem>>, vector<32x16xf32>
    %cst = arith.constant dense<0.000000e+00> : vector<32x256xf32>
    %2 = tpu.matmul %1, %0, %cst {dimension_numbers = #tpu.dot_dimension_numbers<[1], [0], [0], [1], [0, 0, 1, 1], [], []>} : vector<32x16xf32>, vector<16x256xf32>, vector<32x256xf32> -> vector<32x256xf32>
    %c0_3 = arith.constant 0 : index
    %c0_4 = arith.constant 0 : index
    %3 = vector.load %arg3[%c0_3, %c0_4] : memref<32x1xf32, #tpu.memory_space<vmem>>, vector<32x1xf32>
    %4 = vector.broadcast %3 : vector<32x1xf32> to vector<32x256xf32>
    %5 = arith.addf %2, %4 : vector<32x256xf32>
    %6 = math.tanh %5 : vector<32x256xf32>
    %c0_5 = arith.constant 0 : index
    %c0_6 = arith.constant 0 : index
    %7 = vector.load %arg4[%c0_5, %c0_6] : memref<32x32xf32, #tpu.memory_space<vmem>>, vector<32x32xf32>
    %cst_7 = arith.constant dense<0.000000e+00> : vector<32x256xf32>
    %8 = tpu.matmul %7, %6, %cst_7 {dimension_numbers = #tpu.dot_dimension_numbers<[1], [0], [0], [1], [0, 0, 1, 1], [], []>} : vector<32x32xf32>, vector<32x256xf32>, vector<32x256xf32> -> vector<32x256xf32>
    %c0_8 = arith.constant 0 : index
    %c0_9 = arith.constant 0 : index
    %9 = vector.load %arg5[%c0_8, %c0_9] : memref<32x1xf32, #tpu.memory_space<vmem>>, vector<32x1xf32>
    %10 = vector.broadcast %9 : vector<32x1xf32> to vector<32x256xf32>
    %11 = arith.addf %8, %10 : vector<32x256xf32>
    %12 = math.tanh %11 : vector<32x256xf32>
    %c0_10 = arith.constant 0 : index
    %c0_11 = arith.constant 0 : index
    %13 = vector.load %arg6[%c0_10, %c0_11] : memref<8x32xf32, #tpu.memory_space<vmem>>, vector<8x32xf32>
    %cst_12 = arith.constant dense<0.000000e+00> : vector<8x256xf32>
    %14 = tpu.matmul %13, %12, %cst_12 {dimension_numbers = #tpu.dot_dimension_numbers<[1], [0], [0], [1], [0, 0, 1, 1], [], []>} : vector<8x32xf32>, vector<32x256xf32>, vector<8x256xf32> -> vector<8x256xf32>
    %c0_13 = arith.constant 0 : index
    %c0_14 = arith.constant 0 : index
    %15 = vector.load %arg7[%c0_13, %c0_14] : memref<8x1xf32, #tpu.memory_space<vmem>>, vector<8x1xf32>
    %16 = vector.broadcast %15 : vector<8x1xf32> to vector<8x256xf32>
    %17 = arith.addf %14, %16 : vector<8x256xf32>
    %cst_15 = arith.constant dense<0xFF800000> : vector<256xf32>
    %18 = vector.multi_reduction <maximumf>, %17, %cst_15 [0] : vector<8x256xf32> to vector<256xf32>
    %19 = vector.shape_cast %18 : vector<256xf32> to vector<1x256xf32>
    %20 = vector.broadcast %19 : vector<1x256xf32> to vector<8x256xf32>
    %21 = arith.subf %17, %20 : vector<8x256xf32>
    %22 = math.exp %21 : vector<8x256xf32>
    %cst_16 = arith.constant dense<0.000000e+00> : vector<256xf32>
    %23 = vector.multi_reduction <add>, %22, %cst_16 [0] : vector<8x256xf32> to vector<256xf32>
    %24 = vector.shape_cast %23 : vector<256xf32> to vector<1x256xf32>
    %25 = tpu.reciprocal %24 {approx = true} : vector<1x256xf32> -> vector<1x256xf32>
    %26 = arith.mulf %24, %25 : vector<1x256xf32>
    %cst_17 = arith.constant 2.000000e+00 : f32
    %27 = vector.broadcast %cst_17 : f32 to vector<1x256xf32>
    %28 = arith.subf %27, %26 : vector<1x256xf32>
    %29 = arith.mulf %25, %28 : vector<1x256xf32>
    %30 = arith.mulf %24, %29 : vector<1x256xf32>
    %cst_18 = arith.constant 2.000000e+00 : f32
    %31 = vector.broadcast %cst_18 : f32 to vector<1x256xf32>
    %32 = arith.subf %31, %30 : vector<1x256xf32>
    %33 = arith.mulf %29, %32 : vector<1x256xf32>
    %34 = vector.broadcast %33 : vector<1x256xf32> to vector<8x256xf32>
    %35 = arith.mulf %22, %34 : vector<8x256xf32>
    %c0_19 = arith.constant 0 : index
    %c0_20 = arith.constant 0 : index
    %36 = vector.load %arg8[%c0_19, %c0_20] : memref<8x256xf32, #tpu.memory_space<vmem>>, vector<8x256xf32>
    tpu.vector_store %arg8[%c0_19, %c0_20], %35 {strides = array<i32>} : memref<8x256xf32, #tpu.memory_space<vmem>>, vector<8x256xf32>,
    return
  }
  func.func @transform_0(%arg0: i32) -> (i32, i32) {
    %c0_i32 = arith.constant 0 : i32
    %c0_i32_0 = arith.constant 0 : i32
    return %c0_i32, %arg0 : i32, i32
  }
  func.func @transform_1(%arg0: i32) -> (i32, i32) {
    %c0_i32 = arith.constant 0 : i32
    %c0_i32_0 = arith.constant 0 : i32
    %c0_i32_1 = arith.constant 0 : i32
    return %c0_i32, %c0_i32_0 : i32, i32
  }
  func.func @transform_2(%arg0: i32) -> (i32, i32) {
    %c0_i32 = arith.constant 0 : i32
    %c0_i32_0 = arith.constant 0 : i32
    %c0_i32_1 = arith.constant 0 : i32
    return %c0_i32, %c0_i32_0 : i32, i32
  }
  func.func @transform_3(%arg0: i32) -> (i32, i32) {
    %c0_i32 = arith.constant 0 : i32
    %c0_i32_0 = arith.constant 0 : i32
    %c0_i32_1 = arith.constant 0 : i32
    return %c0_i32, %c0_i32_0 : i32, i32
  }
  func.func @transform_4(%arg0: i32) -> (i32, i32) {
    %c0_i32 = arith.constant 0 : i32
    %c0_i32_0 = arith.constant 0 : i32
    %c0_i32_1 = arith.constant 0 : i32
    return %c0_i32, %c0_i32_0 : i32, i32
  }
  func.func @transform_5(%arg0: i32) -> (i32, i32) {
    %c0_i32 = arith.constant 0 : i32
    %c0_i32_0 = arith.constant 0 : i32
    %c0_i32_1 = arith.constant 0 : i32
    return %c0_i32, %c0_i32_0 : i32, i32
  }
  func.func @transform_6(%arg0: i32) -> (i32, i32) {
    %c0_i32 = arith.constant 0 : i32
    %c0_i32_0 = arith.constant 0 : i32
    %c0_i32_1 = arith.constant 0 : i32
    return %c0_i32, %c0_i32_0 : i32, i32
  }
  func.func @transform_7(%arg0: i32) -> (i32, i32) {
    %c0_i32 = arith.constant 0 : i32
    %c0_i32_0 = arith.constant 0 : i32
    return %c0_i32, %arg0 : i32, i32
  }
}

</mosaic_0001>

<bundles_post_ra>
// kernel: actor_mlp_forward.1
= control target key start
LH: loop header
LB: loop body
LE: loop exit
PB: predicated region body
PF: predicated region fallthrough
CT: control target
= control target key end

     0   :  { %vm59_vm0 = vcmask 130048   ;;  %v448_v5 = vmov 0   ;;  %s577_s0 = inlined_call_operand.vmem [shape: f32[16,256], index: 0, kind: input, shape index: {}]   ;;  %s578_s1 = inlined_call_operand.vmem [shape: f32[32,16], index: 1, kind: input, shape index: {}]   ;;  %s579_s2 = inlined_call_operand.vmem [shape: f32[32,1], index: 2, kind: input, shape index: {}]   ;;  %s580_s3 = inlined_call_operand.vmem [shape: f32[32,32], index: 3, kind: input, shape index: {}]   ;;  %s581_s4 = inlined_call_operand.vmem [shape: f32[32,1], index: 4, kind: input, shape index: {}]   ;;  %s582_s5 = inlined_call_operand.vmem [shape: f32[8,32], index: 5, kind: input, shape index: {}]   ;;  %s583_s6 = inlined_call_operand.vmem [shape: f32[8,1], index: 6, kind: input, shape index: {}]   ;;  %s584_s7 = inlined_call_operand.hbm [shape: f32[8,256], index: 7, kind: output, shape index: {}]  }
   0x1   :  { %v29_v0 = vld [vmem:[%s577_s0 + $0x10] sm:$0xff]  ;;  %v30_v1 = vld [vmem:[%s577_s0 + $0x18] sm:$0xff]  ;;  %v27_v2 = vld [vmem:[%s577_s0] sm:$0xff]  ;;  %380 = vset.pattern.permute.xlu1 %v448_v5  ;;  %379 = vset.pattern.permute.xlu0 %v448_v5 }
   0x2   :  { %86 = vmatpush.msra.mxu0 %v29_v0  ;;  %115 = vmatpush.msra.mxu1 %v30_v1  ;;  %v28_v3 = vld [vmem:[%s577_s0 + $0x8] sm:$0xff]  ;;  %v31_v4 = vld [vmem:[%s578_s1] sm:$0xff]  ;;  %v38_v7 = vld [vmem:[%s579_s2 + $0x18] sm:$0xff] }
   0x3   :  { %v36_v6 = vld [vmem:[%s579_s2 + $0x8] sm:$0xff] }
   0x4   :  { %87 = vmatpush.msra.mxu0 %v27_v2  ;;  %116 = vmatpush.msra.mxu1 %v28_v3 }
   0x5   :  { %359 = vmatmul.msk.f32.vlgmr.msra.gmra.mxu0 %vm59_vm0, %v31_v4  ;;  %363 = vmatmul.msk.f32.vlgmr.msra.gmra.mxu1 %vm59_vm0, %v31_v4 }
   0x6   :  { %12 = vsyncpa [#allocation3], 0  ;;  %46 = vperm.xlu1 %380, %v36_v6   ;;  %56 = vperm.xlu0 %379, %v38_v7   ;;  %v32_v8 = vld [vmem:[%s578_s1 + $0x8] sm:$0xff]  ;;  %v35_v9 = vld [vmem:[%s579_s2] sm:$0xff]  ;;  %vm166_vm1 = vcmask 261120   ;;  %s350_s18 = sshll.u32 %s584_s7, 4  ;;  %s351_s18 = int_to_ptr.hbm [resolvable:$true] %s350_s18 }
   0x7   :  { %381 = vset.pattern.permute.xlu2 %v448_v5  ;;  %v37_v10 = vld [vmem:[%s579_s2 + $0x10] sm:$0xff]  ;;  %v143_v12 = vld [vmem:[%s581_s4 + $0x8] sm:$0xff]  ;;  %v142_v13 = vld [vmem:[%s581_s4] sm:$0xff] }
   0x8   :  { %v33_v11 = vld [vmem:[%s578_s1 + $0x10] sm:$0xff]  ;;  %v34_v14 = vld [vmem:[%s578_s1 + $0x18] sm:$0xff]  ;;  %v138_v42 = vld [vmem:[%s580_s3] sm:$0xff] }
   0x9   :  { %v145_v37 = vld [vmem:[%s581_s4 + $0x18] sm:$0xff]  ;;  %v144_v45 = vld [vmem:[%s581_s4 + $0x10] sm:$0xff]  ;;  %v139_v46 = vld [vmem:[%s580_s3 + $0x8] sm:$0xff] }
   0xa   :  { %163 = vperm.xlu2 %381, %v145_v37   ;;  %v246_v47 = vld [vmem:[%s583_s6] sm:$0xff]  ;;  %v140_v48 = vld [vmem:[%s580_s3 + $0x10] sm:$0xff]  ;;  %v141_v49 = vld [vmem:[%s580_s3 + $0x18] sm:$0xff] }
   0xd   :  { %360 = vmatmul.msk.f32.gmra.mxu0 %vm59_vm0, %v32_v8  ;;  %364 = vmatmul.msk.f32.gmra.mxu1 %vm59_vm0, %v32_v8 }
   0xe   :  { %41 = vperm.xlu1 %380, %v35_v9   ;;  %51 = vperm.xlu0 %379, %v37_v10  }
  0x12   :  { %158 = vperm.xlu2 %381, %v144_v45  }
  0x15   :  { %361 = vmatmul.msk.f32.gmra.mxu0 %vm59_vm0, %v33_v11  ;;  %365 = vmatmul.msk.f32.gmra.mxu1 %vm59_vm0, %v33_v11 }
  0x16   :  { %153 = vperm.xlu0 %379, %v143_v12   ;;  %148 = vperm.xlu1 %380, %v142_v13   ;;  %v245_v12 = vld [vmem:[%s582_s5] sm:$0xff]  ;;  %s449_s5 = smov [#allocation2]  }
  0x17   :  { %s348_s15 = sshll.u32 %s449_s5, 4  ;;  %s349_s15 = int_to_ptr.vmem [resolvable:$true] %s348_s15 }
  0x1a   :  { %249 = vperm.xlu2 %381, %v246_v47  }
  0x1d   :  { %362 = vmatmul.msk.f32.gmra.mxu0 %vm59_vm0, %v34_v14  ;;  %366 = vmatmul.msk.f32.gmra.mxu1 %vm59_vm0, %v34_v14 }
  0x64   :  { %v164_v54 = vpop.permute.xlu2 %163 }
  0x6c   :  { %v159_v57 = vpop.permute.xlu2 %158 }
  0x78   :  { %v57_v19 = vpop.permute.xlu0 %56  ;;  %v47_v20 = vpop.permute.xlu1 %46 }
  0x80   :  { %v52_v23 = vpop.permute.xlu0 %51  ;;  %v42_v29 = vpop.permute.xlu1 %41 }
  0x82   :  { %v89_v15 = vpop.f32.mrf.mxu0  ;;  %v118_v16 = vpop.f32.mrf.mxu1 }
  0x83   :  { %v90_v33 = vadd.f32 %v89_v15, %v42_v29  ;;  %v119_v34 = vadd.f32 %v118_v16, %v42_v29  ;;  %v250_v15 = vpop.permute.xlu2 %249 }
  0x88   :  { %v154_v62 = vpop.permute.xlu0 %153  ;;  %v149_v2 = vpop.permute.xlu1 %148 }
  0x8a   :  { %v92_v17 = vpop.f32.mrf.mxu0  ;;  %v121_v18 = vpop.f32.mrf.mxu1 }
  0x8b   :  { %v93_v31 = vadd.f32 %v92_v17, %v47_v20  ;;  %v122_v32 = vadd.f32 %v121_v18, %v47_v20 }
  0x92   :  { %v95_v21 = vpop.f32.mrf.mxu0  ;;  %v124_v22 = vpop.f32.mrf.mxu1 }
  0x93   :  { %v96_v26 = vadd.f32 %v95_v21, %v52_v23  ;;  %v125_v30 = vadd.f32 %v124_v22, %v52_v23 }
  0x9a   :  { %v98_v24 = vpop.f32.mrf.mxu0  ;;  %v127_v25 = vpop.f32.mrf.mxu1 }
  0x9b   :  { %v99_v27 = vadd.f32 %v98_v24, %v57_v19  ;;  %v128_v28 = vadd.f32 %v127_v25, %v57_v19 }
  0x9d   :  { %382 = vtanh.f32 %v99_v27 }
  0x9e   :  { %384 = vtanh.f32 %v128_v28 }
  0x9f   :  { %386 = vtanh.f32 %v96_v26 }
  0xa0   :  { %388 = vtanh.f32 %v125_v30 }
  0xa1   :  { %390 = vtanh.f32 %v93_v31 }
  0xa2   :  { %392 = vtanh.f32 %v122_v32 }
  0xa3   :  { %v383_v35 = vpop.eup %382  ;;  %394 = vtanh.f32 %v90_v33 }
  0xa4   :  { %v385_v36 = vpop.eup %384  ;;  %396 = vtanh.f32 %v119_v34  ;;  %191 = vmatpush.msra.mxu2 %v383_v35 }
  0xa5   :  { %v387_v38 = vpop.eup %386  ;;  %220 = vmatpush.msra.mxu3 %v385_v36 }
  0xa6   :  { %v389_v39 = vpop.eup %388  ;;  %192 = vmatpush.msra.mxu2 %v387_v38 }
  0xa7   :  { %v391_v40 = vpop.eup %390  ;;  %221 = vmatpush.msra.mxu3 %v389_v39 }
  0xa8   :  { %v393_v41 = vpop.eup %392  ;;  %193 = vmatpush.msra.mxu2 %v391_v40 }
  0xa9   :  { %v395_v43 = vpop.eup %394  ;;  %222 = vmatpush.msra.mxu3 %v393_v41 }
  0xaa   :  { %v397_v44 = vpop.eup %396  ;;  %194 = vmatpush.msra.mxu2 %v395_v43 }
  0xab   :  { %223 = vmatpush.msra.mxu3 %v397_v44  ;;  %367 = vmatmul.msk.f32.vlgmr.msra.gmra.mxu2 %vm166_vm1, %v138_v42 }
  0xac   :  { %371 = vmatmul.msk.f32.vlgmr.msra.gmra.mxu3 %vm166_vm1, %v138_v42 }
  0xb3   :  { %368 = vmatmul.msk.f32.gmra.mxu2 %vm166_vm1, %v139_v46 }
  0xb4   :  { %372 = vmatmul.msk.f32.gmra.mxu3 %vm166_vm1, %v139_v46 }
  0xbb   :  { %369 = vmatmul.msk.f32.gmra.mxu2 %vm166_vm1, %v140_v48 }
  0xbc   :  { %373 = vmatmul.msk.f32.gmra.mxu3 %vm166_vm1, %v140_v48 }
  0xc3   :  { %370 = vmatmul.msk.f32.gmra.mxu2 %vm166_vm1, %v141_v49 }
  0xc4   :  { %374 = vmatmul.msk.f32.gmra.mxu3 %vm166_vm1, %v141_v49 }
 0x12e   :  { %v196_v50 = vpop.f32.mrf.mxu2 }
 0x12f   :  { %v225_v51 = vpop.f32.mrf.mxu3  ;;  %v197_v4 = vadd.f32 %v196_v50, %v149_v2 }
 0x130   :  { %v226_v5 = vadd.f32 %v225_v51, %v149_v2 }
 0x136   :  { %v199_v52 = vpop.f32.mrf.mxu2 }
 0x137   :  { %v228_v53 = vpop.f32.mrf.mxu3  ;;  %v200_v1 = vadd.f32 %v199_v52, %v154_v62 }
 0x138   :  { %v229_v3 = vadd.f32 %v228_v53, %v154_v62 }
 0x13e   :  { %v202_v55 = vpop.f32.mrf.mxu2 }
 0x13f   :  { %v231_v56 = vpop.f32.mrf.mxu3  ;;  %v203_v59 = vadd.f32 %v202_v55, %v159_v57 }
 0x140   :  { %v232_v63 = vadd.f32 %v231_v56, %v159_v57 }
 0x146   :  { %v205_v58 = vpop.f32.mrf.mxu2 }
 0x147   :  { %v206_v60 = vadd.f32 %v205_v58, %v164_v54  ;;  %v234_v61 = vpop.f32.mrf.mxu3 }
 0x148   :  { %v235_v0 = vadd.f32 %v234_v61, %v164_v54 }
 0x149   :  { %398 = vtanh.f32 %v206_v60 }
 0x14a   :  { %400 = vtanh.f32 %v235_v0 }
 0x14b   :  { %402 = vtanh.f32 %v203_v59 }
 0x14c   :  { %404 = vtanh.f32 %v232_v63 }
 0x14d   :  { %406 = vtanh.f32 %v200_v1 }
 0x14e   :  { %408 = vtanh.f32 %v229_v3 }
 0x14f   :  { %v399_v6 = vpop.eup %398  ;;  %410 = vtanh.f32 %v197_v4 }
 0x150   :  { %v401_v7 = vpop.eup %400  ;;  %412 = vtanh.f32 %v226_v5  ;;  %267 = vmatpush.msrb.mxu0 %v399_v6 }
 0x151   :  { %v403_v8 = vpop.eup %402  ;;  %287 = vmatpush.msrb.mxu1 %v401_v7 }
 0x152   :  { %v405_v9 = vpop.eup %404  ;;  %268 = vmatpush.msrb.mxu0 %v403_v8 }
 0x153   :  { %v407_v10 = vpop.eup %406  ;;  %288 = vmatpush.msrb.mxu1 %v405_v9 }
 0x154   :  { %v409_v11 = vpop.eup %408  ;;  %269 = vmatpush.msrb.mxu0 %v407_v10 }
 0x155   :  { %v411_v13 = vpop.eup %410  ;;  %289 = vmatpush.msrb.mxu1 %v409_v11 }
 0x156   :  { %v413_v14 = vpop.eup %412  ;;  %270 = vmatpush.msrb.mxu0 %v411_v13 }
 0x157   :  { %290 = vmatpush.msrb.mxu1 %v413_v14  ;;  %375 = vmatmul.msk.f32.vlgmr.msrb.gmra.mxu0 %vm166_vm1, %v245_v12 }
 0x158   :  { %376 = vmatmul.msk.f32.vlgmr.msrb.gmra.mxu1 %vm166_vm1, %v245_v12 }
 0x1d4   :  { %v272_v16 = vpop.f32.mrf.mxu0 }
 0x1d5   :  { %v273_v17 = vadd.f32 %v272_v16, %v250_v15  ;;  %v292_v18 = vpop.f32.mrf.mxu1 }
 0x1d6   :  { %v293_v19 = vadd.f32 %v292_v18, %v250_v15 }
 0x1d7   :  { %v295_v20 = vrot.slane %v273_v17, 4 }
 0x1d8   :  { %v301_v21 = vrot.slane %v293_v19, 4 }
 0x1d9   :  { %v296_v22 = vmax.f32 %v273_v17, %v295_v20 }
 0x1da   :  { %v302_v23 = vmax.f32 %v293_v19, %v301_v21 }
 0x1db   :  { %v297_v24 = vrot.slane %v296_v22, 2 }
 0x1dc   :  { %v303_v25 = vrot.slane %v302_v23, 2 }
 0x1dd   :  { %v298_v26 = vmax.f32 %v296_v22, %v297_v24 }
 0x1de   :  { %v304_v27 = vmax.f32 %v302_v23, %v303_v25 }
 0x1df   :  { %v299_v28 = vrot.slane %v298_v26, 1 }
 0x1e0   :  { %v305_v29 = vrot.slane %v304_v27, 1 }
 0x1e1   :  { %v300_v30 = vmax.f32 %v298_v26, %v299_v28 }
 0x1e2   :  { %v306_v31 = vmax.f32 %v304_v27, %v305_v29 }
 0x1e3   :  { %v307_v32 = vsub.f32 %v273_v17, %v300_v30 }
 0x1e4   :  { %v308_v33 = vsub.f32 %v293_v19, %v306_v31 }
 0x1e5   :  { %v309_v34 = vmul.f32 1.442695, %v307_v32 }
 0x1e6   :  { %v311_v35 = vmul.f32 1.442695, %v308_v33 }
 0x1e7   :  { %414 = vpow2.f32 %v309_v34 }
 0x1e8   :  { %416 = vpow2.f32 %v311_v35 }
 0x1ed   :  { %v415_v36 = vpop.eup %414 }
 0x1ee   :  { %v417_v37 = vpop.eup %416  ;;  %v313_v38 = vrot.slane %v415_v36, 4 }
 0x1ef   :  { %v319_v39 = vrot.slane %v417_v37, 4 }
 0x1f0   :  { %v314_v40 = vadd.f32 %v415_v36, %v313_v38 }
 0x1f1   :  { %v320_v41 = vadd.f32 %v417_v37, %v319_v39 }
 0x1f2   :  { %v315_v42 = vrot.slane %v314_v40, 2 }
 0x1f3   :  { %v321_v43 = vrot.slane %v320_v41, 2 }
 0x1f4   :  { %v316_v44 = vadd.f32 %v315_v42, %v314_v40 }
 0x1f5   :  { %v322_v45 = vadd.f32 %v321_v43, %v320_v41 }
 0x1f6   :  { %v317_v46 = vrot.slane %v316_v44, 1 }
 0x1f7   :  { %v323_v47 = vrot.slane %v322_v45, 1 }
 0x1f8   :  { %v318_v48 = vadd.f32 %v317_v46, %v316_v44 }
 0x1f9   :  { %v324_v49 = vadd.f32 %v323_v47, %v322_v45 }
 0x1fa   :  { %418 = vrcp.f32 %v318_v48 }
 0x1fb   :  { %420 = vrcp.f32 %v324_v49 }
 0x200   :  { %v419_v50 = vpop.eup %418 }
 0x201   :  { %v421_v51 = vpop.eup %420  ;;  %v327_v52 = vmul.f32 %v419_v50, %v318_v48 }
 0x202   :  { %v328_v53 = vmul.f32 %v421_v51, %v324_v49 }
 0x203   :  { %v329_v54 = vsub.f32 2.0, %v327_v52 }
 0x204   :  { %v330_v55 = vsub.f32 2.0, %v328_v53 }
 0x205   :  { %v331_v56 = vmul.f32 %v419_v50, %v329_v54 }
 0x206   :  { %v332_v57 = vmul.f32 %v421_v51, %v330_v55 }
 0x207   :  { %v333_v58 = vmul.f32 %v331_v56, %v318_v48 }
 0x208   :  { %v334_v59 = vmul.f32 %v332_v57, %v324_v49 }
 0x209   :  { %v335_v60 = vsub.f32 2.0, %v333_v58 }
 0x20a   :  { %v336_v61 = vsub.f32 2.0, %v334_v59 }
 0x20b   :  { %v337_v62 = vmul.f32 %v335_v60, %v331_v56 }
 0x20c   :  { %v338_v63 = vmul.f32 %v336_v61, %v332_v57 }
 0x20d   :  { %v339_v0 = vmul.f32 %v415_v36, %v337_v62 }
 0x20e   :  { %v340_v1 = vmul.f32 %v417_v37, %v338_v63 }
 0x20f   :  { %341 = vst [vmem:[#allocation2] sm:$0xff] %v339_v0 }
 0x210   :  { %342 = vst [vmem:[#allocation2 + $0x8] sm:$0xff] %v340_v1 }
 0x211   :  { %353 = dma.vmem_to_hbm [thread:$0]  %s349_s15, 256, %s351_s18, [#allocation3]  }
 0x212   :  { %446 = dma.done.wait [#allocation3], 256  }
 0x213   :  { %447 = vsyncadd [#allocation3], 4294967040 }
 0x214   :  { %358 = vsyncpa [#allocation3], 1 }

</bundles_post_ra>
